<compile_context>
chip_gen: v7x
topology: tpu7x:2x2x1
jax: 0.10.0
libtpu: 0.0.40
codegen_flags: <defaults>
</compile_context>

<pallas_src>
import functools

import jax
import jax.numpy as jnp
from jax.experimental import pallas as pl
from jax.experimental.pallas import tpu as pltpu

F_OUT_PAD = 128  # lane-dense width of the final output slab (128-lane vreg)


# ---------------------------------------------------------------------------
# Fused kernel: all GCN layers in one invocation, A and H resident in VMEM.
# ---------------------------------------------------------------------------
def _gcn_fused_kernel(a_ref, x_ref, *rest):
    """a_ref : (N, N)         f32  normalized adjacency (resident all layers)
       x_ref : (N, in_feats)  f32  input node features
       rest  : (w_0, b_0, ..., w_{L-1}, b_{L-1}, o_ref)
               w_l : (f_in_l, f_out_l) f32  (last layer padded to F_OUT_PAD cols)
               b_l : (1, f_out_l)      f32
               o_ref: (N, F_OUT_PAD)   f32  lane-dense output slab
    """
    o_ref = rest[-1]
    param_refs = rest[:-1]
    n_layers = len(param_refs) // 2

    a = a_ref[...]          # adjacency stays in VMEM/vregs for every layer
    h = x_ref[...]          # running node features, f32
    for l in range(n_layers):                       # static, unrolled
        w = param_refs[2 * l][...]
        b = param_refs[2 * l + 1][...]
        # Cheaper association chosen from the TRUE per-layer operand widths:
        # the O(N^2) aggregation runs at width min(f_in, f_out).
        if h.shape[1] <= w.shape[1]:
            # (A @ H) @ W  -- aggregate at width f_in, then project
            ah = jnp.dot(a, h, preferred_element_type=jnp.float32)
            z = jnp.dot(ah, w, preferred_element_type=jnp.float32)
        else:
            # A @ (H @ W)  -- project first, aggregate at width f_out
            hw = jnp.dot(h, w, preferred_element_type=jnp.float32)
            z = jnp.dot(a, hw, preferred_element_type=jnp.float32)
        z = z + b                                   # bias broadcast over nodes
        if l != n_layers - 1:
            z = jnp.maximum(z, 0.0)                 # ReLU on all but last layer
        # inter-layer dropout is identity at inference time -> no-op
        h = z
    o_ref[...] = h                                  # unmasked lane-dense store


# ---------------------------------------------------------------------------
# One-time model setup: pad/cast parameters ONCE, return a jitted forward(x).
# ---------------------------------------------------------------------------
def make_gcn_forward(a_norm, params):
    """params: list of (W: (f_in, f_out), b: (1, f_out)).
    Returns forward(x) -> (N, n_classes), jitted, with all prep hoisted."""
    n = a_norm.shape[0]
    n_layers = len(params)
    n_classes = params[-1][0].shape[1]

    # ---- init-time prep (runs once, NOT on the hot path) -------------------
    a_f32 = a_norm.astype(jnp.float32)
    prepped = []
    for l, (w, b) in enumerate(params):
        w = w.astype(jnp.float32)
        b = b.astype(jnp.float32).reshape(1, -1)
        if l == n_layers - 1:
            # Zero-pad last layer to a lane-dense output width: padding columns
            # are exactly zero, so the first n_classes columns are unchanged.
            w_p = jnp.zeros((w.shape[0], F_OUT_PAD), jnp.float32)
            w_p = w_p.at[:, : w.shape[1]].set(w)
            b_p = jnp.zeros((1, F_OUT_PAD), jnp.float32)
            b_p = b_p.at[:, : b.shape[1]].set(b)
            prepped += [w_p, b_p]
        else:
            prepped += [w, b]
    prepped = tuple(jax.device_put(p) for p in prepped)

    # ---- cost estimate from the TRUE computed dims --------------------------
    flops = 0
    bytes_accessed = a_f32.size * 4 + n * params[0][0].shape[0] * 4
    f_in = params[0][0].shape[0]
    for l in range(n_layers):
        w_l = prepped[2 * l]
        f_out = w_l.shape[1]
        if f_in <= f_out:
            flops += 2 * n * n * f_in + 2 * n * f_in * f_out
        else:
            flops += 2 * n * f_in * f_out + 2 * n * n * f_out
        bytes_accessed += (w_l.size + prepped[2 * l + 1].size) * 4
        f_in = f_out
    bytes_accessed += n * F_OUT_PAD * 4

    vmem_spec = pl.BlockSpec(memory_space=pltpu.MemorySpace.VMEM)
    call = pl.pallas_call(
        _gcn_fused_kernel,
        out_shape=jax.ShapeDtypeStruct((n, F_OUT_PAD), jnp.float32),
        in_specs=[vmem_spec] * (2 + 2 * n_layers),
        out_specs=vmem_spec,
        cost_estimate=pl.CostEstimate(
            flops=flops, transcendentals=0, bytes_accessed=bytes_accessed),
    )

    @jax.jit
    def forward(x):
        out_pad = call(a_f32, x.astype(jnp.float32), *prepped)
        return out_pad[:, :n_classes]

    return forward


# ---------------------------------------------------------------------------
# Parameter / graph construction (deterministic)
# ---------------------------------------------------------------------------
def init_params(key, in_feats, n_hidden, n_classes, n_layers):
    dims = [in_feats] + [n_hidden] * (n_layers - 1) + [n_classes]
    params = []
    for l in range(n_layers):
        key, kw = jax.random.split(key)
        fan_in, fan_out = dims[l], dims[l + 1]
        limit = (6.0 / (fan_in + fan_out)) ** 0.5   # Glorot-uniform, bias 0
        w = jax.random.uniform(kw, (fan_in, fan_out), jnp.float32, -limit, limit)
        b = jnp.zeros((1, fan_out), jnp.float32)
        params.append((w, b))
    return params


def build_normalized_adjacency(key, n_nodes, edge_prob=0.3):
    u = jax.random.uniform(key, (n_nodes, n_nodes))
    a = (u < edge_prob).astype(jnp.float32)
    a = jnp.maximum(a, a.T)                      # symmetric
    a = a + jnp.eye(n_nodes, dtype=jnp.float32)  # add self loops (A + I)
    deg = jnp.sum(a, axis=1)
    d_inv_sqrt = 1.0 / jnp.sqrt(deg)
    return a * d_inv_sqrt[:, None] * d_inv_sqrt[None, :]


if __name__ == "__main__":
    key = jax.random.PRNGKey(0)
    k_graph, k_feat, k_param = jax.random.split(key, 3)

    # Small shapes consistent with the module's constructor.
    n_nodes, in_feats, n_hidden, n_classes, n_layers = 32, 16, 32, 8, 3

    a_norm = build_normalized_adjacency(k_graph, n_nodes)
    x = jax.random.normal(k_feat, (n_nodes, in_feats), jnp.float32)
    params = init_params(k_param, in_feats, n_hidden, n_classes, n_layers)

    forward = make_gcn_forward(a_norm, params)   # all prep + jit happen here
    out = jax.block_until_ready(forward(x))

    # Pure-JAX f32 reference (same association as the PyTorch/DGL module:
    # A @ (H @ W); the kernel may re-associate, so allow modest rounding slack
    # from the TPU's default matmul precision).
    h = x
    for l, (w, b) in enumerate(params):
        h = a_norm @ (h @ w) + b
        if l != n_layers - 1:
            h = jnp.maximum(h, 0.0)

    assert out.shape == (n_nodes, n_classes)
    assert bool(jnp.all(jnp.isfinite(out)))
    assert bool(jnp.allclose(out, h, rtol=2e-2, atol=1e-2)), (
        "max abs diff vs f32 reference: "
        + str(float(jnp.max(jnp.abs(out - h)))))
    print("KERNEL_OK")
</pallas_src>

<mosaic_0001>
module attributes {stable_mosaic.version = 11 : i64} {
  func.func @_gcn_fused_kernel(%arg0: memref<32x32xf32, #tpu.memory_space<vmem>>, %arg1: memref<32x16xf32, #tpu.memory_space<vmem>>, %arg2: memref<16x32xf32, #tpu.memory_space<vmem>>, %arg3: memref<1x32xf32, #tpu.memory_space<vmem>>, %arg4: memref<32x32xf32, #tpu.memory_space<vmem>>, %arg5: memref<1x32xf32, #tpu.memory_space<vmem>>, %arg6: memref<32x128xf32, #tpu.memory_space<vmem>>, %arg7: memref<1x128xf32, #tpu.memory_space<vmem>>, %arg8: memref<32x128xf32, #tpu.memory_space<vmem>>) attributes {dimension_semantics = [], scalar_prefetch = 0 : i64, scratch_operands = 0 : i64, tpu.core_type = #tpu.core_type<tc>} {
    %c0 = arith.constant 0 : index
    %c0_0 = arith.constant 0 : index
    %0 = vector.load %arg0[%c0, %c0_0] : memref<32x32xf32, #tpu.memory_space<vmem>>, vector<32x32xf32>
    %c0_1 = arith.constant 0 : index
    %c0_2 = arith.constant 0 : index
    %1 = vector.load %arg1[%c0_1, %c0_2] : memref<32x16xf32, #tpu.memory_space<vmem>>, vector<32x16xf32>
    %c0_3 = arith.constant 0 : index
    %c0_4 = arith.constant 0 : index
    %2 = vector.load %arg2[%c0_3, %c0_4] : memref<16x32xf32, #tpu.memory_space<vmem>>, vector<16x32xf32>
    %c0_5 = arith.constant 0 : index
    %c0_6 = arith.constant 0 : index
    %3 = vector.load %arg3[%c0_5, %c0_6] : memref<1x32xf32, #tpu.memory_space<vmem>>, vector<1x32xf32>
    %cst = arith.constant dense<0.000000e+00> : vector<32x16xf32>
    %4 = tpu.matmul %0, %1, %cst {dimension_numbers = #tpu.dot_dimension_numbers<[1], [0], [0], [1], [0, 0, 1, 1], [], []>} : vector<32x32xf32>, vector<32x16xf32>, vector<32x16xf32> -> vector<32x16xf32>
    %cst_7 = arith.constant dense<0.000000e+00> : vector<32x32xf32>
    %5 = tpu.matmul %4, %2, %cst_7 {dimension_numbers = #tpu.dot_dimension_numbers<[1], [0], [0], [1], [0, 0, 1, 1], [], []>} : vector<32x16xf32>, vector<16x32xf32>, vector<32x32xf32> -> vector<32x32xf32>
    %6 = vector.broadcast %3 : vector<1x32xf32> to vector<32x32xf32>
    %7 = arith.addf %5, %6 : vector<32x32xf32>
    %cst_8 = arith.constant 0.000000e+00 : f32
    %8 = vector.broadcast %cst_8 : f32 to vector<32x32xf32>
    %9 = arith.maximumf %7, %8 : vector<32x32xf32>
    %c0_9 = arith.constant 0 : index
    %c0_10 = arith.constant 0 : index
    %10 = vector.load %arg4[%c0_9, %c0_10] : memref<32x32xf32, #tpu.memory_space<vmem>>, vector<32x32xf32>
    %c0_11 = arith.constant 0 : index
    %c0_12 = arith.constant 0 : index
    %11 = vector.load %arg5[%c0_11, %c0_12] : memref<1x32xf32, #tpu.memory_space<vmem>>, vector<1x32xf32>
    %cst_13 = arith.constant dense<0.000000e+00> : vector<32x32xf32>
    %12 = tpu.matmul %0, %9, %cst_13 {dimension_numbers = #tpu.dot_dimension_numbers<[1], [0], [0], [1], [0, 0, 1, 1], [], []>} : vector<32x32xf32>, vector<32x32xf32>, vector<32x32xf32> -> vector<32x32xf32>
    %cst_14 = arith.constant dense<0.000000e+00> : vector<32x32xf32>
    %13 = tpu.matmul %12, %10, %cst_14 {dimension_numbers = #tpu.dot_dimension_numbers<[1], [0], [0], [1], [0, 0, 1, 1], [], []>} : vector<32x32xf32>, vector<32x32xf32>, vector<32x32xf32> -> vector<32x32xf32>
    %14 = vector.broadcast %11 : vector<1x32xf32> to vector<32x32xf32>
    %15 = arith.addf %13, %14 : vector<32x32xf32>
    %cst_15 = arith.constant 0.000000e+00 : f32
    %16 = vector.broadcast %cst_15 : f32 to vector<32x32xf32>
    %17 = arith.maximumf %15, %16 : vector<32x32xf32>
    %c0_16 = arith.constant 0 : index
    %c0_17 = arith.constant 0 : index
    %18 = vector.load %arg6[%c0_16, %c0_17] : memref<32x128xf32, #tpu.memory_space<vmem>>, vector<32x128xf32>
    %c0_18 = arith.constant 0 : index
    %c0_19 = arith.constant 0 : index
    %19 = vector.load %arg7[%c0_18, %c0_19] : memref<1x128xf32, #tpu.memory_space<vmem>>, vector<1x128xf32>
    %cst_20 = arith.constant dense<0.000000e+00> : vector<32x32xf32>
    %20 = tpu.matmul %0, %17, %cst_20 {dimension_numbers = #tpu.dot_dimension_numbers<[1], [0], [0], [1], [0, 0, 1, 1], [], []>} : vector<32x32xf32>, vector<32x32xf32>, vector<32x32xf32> -> vector<32x32xf32>
    %cst_21 = arith.constant dense<0.000000e+00> : vector<32x128xf32>
    %21 = tpu.matmul %20, %18, %cst_21 {dimension_numbers = #tpu.dot_dimension_numbers<[1], [0], [0], [1], [0, 0, 1, 1], [], []>} : vector<32x32xf32>, vector<32x128xf32>, vector<32x128xf32> -> vector<32x128xf32>
    %22 = vector.broadcast %19 : vector<1x128xf32> to vector<32x128xf32>
    %23 = arith.addf %21, %22 : vector<32x128xf32>
    %c0_22 = arith.constant 0 : index
    %c0_23 = arith.constant 0 : index
    %24 = vector.load %arg8[%c0_22, %c0_23] : memref<32x128xf32, #tpu.memory_space<vmem>>, vector<32x128xf32>
    tpu.vector_store %arg8[%c0_22, %c0_23], %23 {strides = array<i32>} : memref<32x128xf32, #tpu.memory_space<vmem>>, vector<32x128xf32>,
    return
  }
}

</mosaic_0001>

<bundles_post_ra>
// kernel: forward.1
= control target key start
LH: loop header
LB: loop body
LE: loop exit
PB: predicated region body
PF: predicated region fallthrough
CT: control target
= control target key end

     0   :  { %13 = vsyncpa [#allocation3], 0  ;;  %s1088_s0 = inlined_call_operand.hbm [shape: f32[32,32], index: 0, kind: input, shape index: {}]   ;;  %s1089_s1 = inlined_call_operand.vmem [shape: f32[32,16], index: 1, kind: input, shape index: {}]   ;;  %s1090_s2 = inlined_call_operand.hbm [shape: f32[16,32], index: 2, kind: input, shape index: {}]   ;;  %s1091_s3 = inlined_call_operand.vmem [shape: f32[1,32], index: 3, kind: input, shape index: {}, may-alias: {3,5}]   ;;  %s1092_s4 = inlined_call_operand.vmem [shape: f32[32,32], index: 4, kind: input, shape index: {}]   ;;  %s1093_s5 = inlined_call_operand.vmem [shape: f32[1,32], index: 5, kind: input, shape index: {}, may-alias: {3,5}]   ;;  %s1094_s6 = inlined_call_operand.vmem [shape: f32[32,128], index: 6, kind: input, shape index: {}]   ;;  %s1095_s7 = inlined_call_operand.vmem [shape: f32[1,128], index: 7, kind: input, shape index: {}]   ;;  %s1096_s8 = inlined_call_operand.vmem [shape: f32[32,128], index: 8, kind: output, shape index: {}]  }
   0x1   :  { %14 = vsyncpa [#allocation5], 0  ;;  %s923_s27 = smov [#allocation2]   ;;  %s875_s9 = scalar_lea.hbm %s1088_s0, 512 }
   0x2   :  { %s20_s28 = sshll.u32 %s923_s27, 4  ;;  %p876_p0 = scmp.ne.s32.totalorder %s1088_s0, %s875_s9  ;;  %s21_s28 = int_to_ptr.vmem [resolvable:$true] %s20_s28 }
   0x3   :  { %p879_p1 = scmp.lt.u32.totalorder %s875_s9, %s1088_s0 }
   0x5   :  { %p881_p2 = pnand %p879_p1, %p876_p0 }
   0x7   :  { %884 = shalt.err (!%p881_p2)
}
   0x8   :  { %s885_s14 = scalar_lea.vmem %s21_s28, 512  ;;  %p890_p4 = scmp.lt.s32.totalorder %s21_s28, %s21_s28 }
   0x9   :  { %p886_p3 = scmp.ne.s32.totalorder %s21_s28, %s885_s14  ;;  %p891_p5 = scmp.lt.s32.totalorder %s885_s14, %s885_s14 }
   0xb   :  { %p892_p6 = por %p891_p5, %p890_p4 }
   0xd   :  { %p893_p7 = pnand %p892_p6, %p886_p3 }
   0xf   :  { %896 = shalt.err (!%p893_p7)
}
  0x10   :  { %s924_s15 = smov 128   ;;  %s925_s16 = smov 8  }
  0x11   :  { %26 = dma.hbm_to_vmem [thread:$0]  %s1088_s0, 512, %s21_s28, [#allocation3], %s924_s15, %s924_s15, %s925_s16  }
  0x12   :  { %s926_s19 = smov [#allocation4]   ;;  %s897_s23 = scalar_lea.hbm %s1090_s2, 256 }
  0x13   :  { %s34_s20 = sshll.u32 %s926_s19, 4  ;;  %p898_p8 = scmp.ne.s32.totalorder %s1090_s2, %s897_s23  ;;  %s35_s20 = int_to_ptr.vmem [resolvable:$true] %s34_s20 }
  0x14   :  { %p901_p9 = scmp.lt.u32.totalorder %s897_s23, %s1090_s2 }
  0x16   :  { %p903_p10 = pnand %p901_p9, %p898_p8 }
  0x18   :  { %906 = shalt.err (!%p903_p10)
}
  0x19   :  { %s907_s29 = scalar_lea.vmem %s35_s20, 256  ;;  %p912_p12 = scmp.lt.s32.totalorder %s35_s20, %s35_s20 }
  0x1a   :  { %p908_p11 = scmp.ne.s32.totalorder %s35_s20, %s907_s29  ;;  %p913_p13 = scmp.lt.s32.totalorder %s907_s29, %s907_s29 }
  0x1c   :  { %p914_p0 = por %p913_p13, %p912_p12 }
  0x1e   :  { %p915_p1 = pnand %p914_p0, %p908_p11 }
  0x20   :  { %918 = shalt.err (!%p915_p1)
}
  0x21   :  { %40 = dma.hbm_to_vmem [thread:$0]  %s1090_s2, 256, %s35_s20, [#allocation5], %s924_s15, %s924_s15, %s925_s16  }
  0x22   :  { %919 = dma.done.wait [#allocation3], 512  }
  0x23   :  { %920 = vsyncadd [#allocation3], 4294966784 }
  0x24   :  { %921 = dma.done.wait [#allocation5], 256  }
  0x25   :  { %922 = vsyncadd [#allocation5], 4294967040  ;;  %vm68_vm0 = vcmask 261120   ;;  %v61_v0 = vld [vmem:[%s1089_s1] sm:$0xff]  ;;  %v62_v1 = vld [vmem:[%s1089_s1 + $0x8] sm:$0xff]  ;;  %vm172_vm1 = vcmask 130048  }
  0x26   :  { %v63_v2 = vld [vmem:[%s1089_s1 + $0x10] sm:$0xff]  ;;  %v827_v3 = vpack.c.bf16 %v62_v1, %v61_v0  ;;  %v64_v4 = vld [vmem:[%s1089_s1 + $0x18] sm:$0xff]  ;;  %v57_v5 = vld [vmem:[#allocation2] sm:$0xff] }
  0x27   :  { %v831_v6 = vpack.c.bf16 %v64_v4, %v63_v2  ;;  %755 = vmatprep.mubr.msk.f32.mxu0 %vm68_vm0, %v57_v5  ;;  %v65_v7 = vld [vmem:[#allocation4] sm:$0xff]  ;;  %v66_v8 = vld [vmem:[#allocation4 + $0x8] sm:$0xff]  ;;  %v1011_v11 = vld [vmem:[#allocation2 + $0x10] sm:$0xff] }
  0x28   :  { %828 = vmatprep.subr.bf16.mxu0 %v827_v3  ;;  %v835_v9 = vpack.c.bf16 %v66_v8, %v65_v7  ;;  %v1009_v10 = vld [vmem:[#allocation2 + $0x8] sm:$0xff]  ;;  %v1017_v12 = vld [vmem:[#allocation2 + $0x18] sm:$0xff]  ;;  %v274_v17 = vld [vmem:[%s1092_s4] sm:$0xff] }
  0x29   :  { %830 = vmatpush3.bf16.msra.mxu0 %v827_v3  ;;  %v275_v18 = vld [vmem:[%s1092_s4 + $0x8] sm:$0xff]  ;;  %v276_v19 = vld [vmem:[%s1092_s4 + $0x10] sm:$0xff]  ;;  %v277_v21 = vld [vmem:[%s1092_s4 + $0x18] sm:$0xff] }
  0x2a   :  { %832 = vmatprep.subr.bf16.mxu0 %v831_v6  ;;  %836 = vmatprep.subr.bf16.mxu1 %v835_v9  ;;  %v847_v20 = vpack.c.bf16 %v275_v18, %v274_v17  ;;  %v851_v22 = vpack.c.bf16 %v277_v21, %v276_v19  ;;  %v678_v23 = vld [vmem:[%s1091_s3] ss:$0 sm:$0xff]  ;;  %v472_v43 = vld [vmem:[%s1094_s6 + $0x8] sm:$0xff]  ;;  %v473_v44 = vld [vmem:[%s1094_s6 + $0x10] sm:$0xff] }
  0x2b   :  { %838 = vmatpush3.bf16.msra.mxu1 %v835_v9  ;;  %v471_v42 = vld [vmem:[%s1094_s6] sm:$0xff]  ;;  %v474_v46 = vld [vmem:[%s1094_s6 + $0x18] sm:$0xff] }
  0x2c   :  { %v863_v45 = vpack.c.bf16 %v472_v43, %v471_v42  ;;  %v867_v47 = vpack.c.bf16 %v474_v46, %v473_v44  ;;  %v687_v48 = vld [vmem:[%s1093_s5] ss:$0 sm:$0xff] }
  0x2d   :  { %834 = vmatpush3.bf16.msra.mxu0 %v831_v6  ;;  %v696_v3 = vld [vmem:[%s1095_s7] ss:$0 sm:$0xff] }
  0x2e   :  { %848 = vmatprep.subr.bf16.mxu0 %v847_v20 }
  0x30   :  { %756 = vmatmul.mubr.msk.f32.vlgmr.msra.gmra.mrb[0].mxu0 %vm68_vm0, %v1009_v10 }
  0x31   :  { %758 = vmatprep.mubr.msk.f32.mxu0 %vm68_vm0, %v1011_v11  ;;  %850 = vmatpush3.bf16.msra.mxu0 %v847_v20 }
  0x32   :  { %852 = vmatprep.subr.bf16.mxu0 %v851_v22 }
  0x34   :  { %759 = vmatmul.mubr.msk.f32.gmra.mrb[2].mxu0 %vm68_vm0, %v1017_v12 }
  0x35   :  { %854 = vmatpush3.bf16.msra.mxu0 %v851_v22 }
  0x36   :  { %864 = vmatprep.subr.bf16.mxu0 %v863_v45 }
 0x103   :  { %v757_v13 = vpop.f32.mrb[0].mxu0 }
 0x104   :  { %v147_v14 = vpop.f32.mrb[1].mxu0 }
 0x105   :  { %765 = vmatprep.mubr.msk.f32.mxu1 %vm172_vm1, %v147_v14 }
 0x106   :  { %766 = vmatmul.mubr.msk.f32.vlgmr.msra.gmra.mrb[0].mxu1 %vm172_vm1, %v757_v13 }
 0x107   :  { %v760_v15 = vpop.f32.mrb[2].mxu0 }
 0x108   :  { %v157_v16 = vpop.f32.mrb[3].mxu0 }
 0x109   :  { %768 = vmatprep.mubr.msk.f32.mxu1 %vm172_vm1, %v157_v16 }
 0x10a   :  { %769 = vmatmul.mubr.msk.f32.gmra.mrb[2].mxu1 %vm172_vm1, %v760_v15 }
 0x10b   :  { %779 = vmatprep.mubr.msk.f32.mxu1 %vm68_vm0, %v57_v5 }
 0x1d9   :  { %v767_v24 = vpop.f32.mrb[0].mxu1 }
 0x1da   :  { %v257_v25 = vadd.f32 %v767_v24, %v678_v23  ;;  %v251_v26 = vpop.f32.mrb[1].mxu1 }
 0x1db   :  { %v252_v27 = vadd.f32 %v678_v23, %v251_v26 }
 0x1dc   :  { %v271_v28 = vmax.f32 %v257_v25, 0.0 }
 0x1dd   :  { %v270_v29 = vmax.f32 %v252_v27, 0.0  ;;  %v770_v30 = vpop.f32.mrb[2].mxu1 }
 0x1de   :  { %v267_v31 = vadd.f32 %v770_v30, %v678_v23  ;;  %v261_v32 = vpop.f32.mrb[3].mxu1 }
 0x1df   :  { %v839_v33 = vpack.c.bf16 %v271_v28, %v270_v29  ;;  %v262_v34 = vadd.f32 %v678_v23, %v261_v32 }
 0x1e0   :  { %v273_v35 = vmax.f32 %v267_v31, 0.0 }
 0x1e1   :  { %v272_v36 = vmax.f32 %v262_v34, 0.0  ;;  %840 = vmatprep.subr.bf16.mxu1 %v839_v33 }
 0x1e2   :  { %842 = vmatpush3.bf16.msra.mxu1 %v839_v33 }
 0x1e3   :  { %v843_v37 = vpack.c.bf16 %v273_v35, %v272_v36 }
 0x1e5   :  { %844 = vmatprep.subr.bf16.mxu1 %v843_v37 }
 0x1e6   :  { %846 = vmatpush3.bf16.msra.mxu1 %v843_v37 }
 0x1e9   :  { %780 = vmatmul.mubr.msk.f32.vlgmr.msra.gmra.mrb[4].mxu1 %vm68_vm0, %v1009_v10 }
 0x1ea   :  { %782 = vmatprep.mubr.msk.f32.mxu1 %vm68_vm0, %v1011_v11 }
 0x1ed   :  { %783 = vmatmul.mubr.msk.f32.gmra.mrb[6].mxu1 %vm68_vm0, %v1017_v12 }
 0x1ee   :  { %807 = vmatprep.mubr.msk.f32.mxu1 %vm68_vm0, %v57_v5 }
 0x2bc   :  { %v781_v38 = vpop.f32.mrb[4].mxu1 }
 0x2bd   :  { %v345_v39 = vpop.f32.mrb[5].mxu1 }
 0x2be   :  { %793 = vmatprep.mubr.msk.f32.mxu0 %vm68_vm0, %v345_v39 }
 0x2bf   :  { %794 = vmatmul.mubr.msk.f32.vlgmr.msra.gmra.mrb[4].mxu0 %vm68_vm0, %v781_v38 }
 0x2c0   :  { %v784_v40 = vpop.f32.mrb[6].mxu1  ;;  %866 = vmatpush3.bf16.msra.mxu0 %v863_v45 }
 0x2c1   :  { %v355_v41 = vpop.f32.mrb[7].mxu1  ;;  %868 = vmatprep.subr.bf16.mxu0 %v867_v47 }
 0x2c2   :  { %796 = vmatprep.mubr.msk.f32.mxu0 %vm68_vm0, %v355_v41 }
 0x2c3   :  { %797 = vmatmul.mubr.msk.f32.gmra.mrb[6].mxu0 %vm68_vm0, %v784_v40 }
 0x2c4   :  { %870 = vmatpush3.bf16.msra.mxu0 %v867_v47 }
 0x392   :  { %v795_v49 = vpop.f32.mrb[4].mxu0 }
 0x393   :  { %v454_v50 = vadd.f32 %v795_v49, %v687_v48  ;;  %v448_v51 = vpop.f32.mrb[5].mxu0 }
 0x394   :  { %v449_v52 = vadd.f32 %v687_v48, %v448_v51 }
 0x395   :  { %v468_v53 = vmax.f32 %v454_v50, 0.0 }
 0x396   :  { %v467_v54 = vmax.f32 %v449_v52, 0.0  ;;  %v798_v55 = vpop.f32.mrb[6].mxu0 }
 0x397   :  { %v464_v56 = vadd.f32 %v798_v55, %v687_v48  ;;  %v458_v57 = vpop.f32.mrb[7].mxu0 }
 0x398   :  { %v855_v58 = vpack.c.bf16 %v468_v53, %v467_v54  ;;  %v459_v59 = vadd.f32 %v687_v48, %v458_v57 }
 0x399   :  { %v470_v60 = vmax.f32 %v464_v56, 0.0 }
 0x39a   :  { %v469_v61 = vmax.f32 %v459_v59, 0.0  ;;  %856 = vmatprep.subr.bf16.mxu1 %v855_v58 }
 0x39b   :  { %858 = vmatpush3.bf16.msra.mxu1 %v855_v58 }
 0x39c   :  { %v859_v62 = vpack.c.bf16 %v470_v60, %v469_v61 }
 0x39e   :  { %860 = vmatprep.subr.bf16.mxu1 %v859_v62 }
 0x39f   :  { %862 = vmatpush3.bf16.msra.mxu1 %v859_v62 }
 0x3a2   :  { %808 = vmatmul.mubr.msk.f32.vlgmr.msra.gmra.mrb[8].mxu1 %vm68_vm0, %v1009_v10 }
 0x3a3   :  { %810 = vmatprep.mubr.msk.f32.mxu1 %vm68_vm0, %v1011_v11 }
 0x3a6   :  { %811 = vmatmul.mubr.msk.f32.gmra.mrb[10].mxu1 %vm68_vm0, %v1017_v12 }
 0x475   :  { %v809_v63 = vpop.f32.mrb[8].mxu1 }
 0x476   :  { %v542_v0 = vpop.f32.mrb[9].mxu1 }
 0x477   :  { %821 = vmatprep.mubr.msk.f32.mxu0 %vm68_vm0, %v542_v0 }
 0x478   :  { %822 = vmatmul.mubr.msk.f32.vlgmr.msra.gmra.mrb[8].mxu0 %vm68_vm0, %v809_v63 }
 0x479   :  { %v812_v1 = vpop.f32.mrb[10].mxu1 }
 0x47a   :  { %v552_v2 = vpop.f32.mrb[11].mxu1 }
 0x47b   :  { %824 = vmatprep.mubr.msk.f32.mxu0 %vm68_vm0, %v552_v2 }
 0x47c   :  { %825 = vmatmul.mubr.msk.f32.gmra.mrb[10].mxu0 %vm68_vm0, %v812_v1 }
 0x54b   :  { %v823_v4 = vpop.f32.mrb[8].mxu0 }
 0x54c   :  { %v651_v5 = vadd.f32 %v823_v4, %v696_v3  ;;  %v645_v6 = vpop.f32.mrb[9].mxu0 }
 0x54d   :  { %v646_v7 = vadd.f32 %v696_v3, %v645_v6 }
 0x54e   :  { %665 = vst [vmem:[%s1096_s8 + $0x8] sm:$0xff] %v651_v5 }
 0x54f   :  { %664 = vst [vmem:[%s1096_s8] sm:$0xff] %v646_v7  ;;  %v826_v8 = vpop.f32.mrb[10].mxu0 }
 0x550   :  { %v661_v9 = vadd.f32 %v826_v8, %v696_v3  ;;  %v655_v10 = vpop.f32.mrb[11].mxu0 }
 0x551   :  { %v656_v11 = vadd.f32 %v696_v3, %v655_v10 }
 0x552   :  { %667 = vst [vmem:[%s1096_s8 + $0x18] sm:$0xff] %v661_v9 }
 0x553   :  { %666 = vst [vmem:[%s1096_s8 + $0x10] sm:$0xff] %v656_v11 }
 0x554   :  { %672 = vsyncpa [#allocation3], 1 }
 0x555   :  { %673 = vsyncpa [#allocation5], 1 }

</bundles_post_ra>
